<compile_context>
chip_gen: v5e
topology: v5e:2x2
jax: 0.10.0
libtpu: 0.0.40
codegen_flags: <defaults>
</compile_context>

<pallas_src>
import functools

import jax
import jax.numpy as jnp
import numpy as np
from jax.experimental import pallas as pl
from jax.experimental.pallas import tpu as pltpu

_LANES = 128
_MIB = 1024 * 1024


def _device_kind() -> str:
    try:
        return jax.devices()[0].device_kind.lower()
    except Exception:  # defensive: never let detection break the op
        return ""


_KIND = _device_kind()
_IS_V7 = "v7" in _KIND
_IS_V5 = "v5" in _KIND

# v7x (~3.2 TB/s HBM) needs bigger tiles to amortize the ~0.35 us/grid-step
# overhead; v5e (~0.82 TB/s) is already DMA-saturated at 2 MiB.
_TILE_BYTES = 8 * _MIB if _IS_V7 else (2 * _MIB if _IS_V5 else 4 * _MIB)
# 2 buffers x (in + out) x 8 MiB max tile = 32 MiB; 48 MiB leaves compiler
# scratch headroom and stays under v7x's 64 MiB physical VMEM.
_VMEM_LIMIT_BYTES = 48 * _MIB


def _scale_kernel(log_scale_ref, x_ref, o_ref, *, max_logit_scale):
    # Scalar path (SMEM): exp + clip of the learnable log scale in f32.
    scale = jnp.minimum(jnp.exp(log_scale_ref[0]), max_logit_scale)
    # Vector path (VMEM): broadcast-multiply the tile in the input precision
    # (dtype-preserving, like torch's 0-d f32 param * bf16 tensor -> bf16).
    o_ref[...] = (x_ref[...] * scale.astype(x_ref.dtype)).astype(o_ref.dtype)


def learnable_logit_scaling(x, log_logit_scale, *, max_logit_scale=100.0,
                            donate_input=False):
    """clip(exp(log_logit_scale), max_logit_scale) * x, via a Pallas kernel."""
    orig_shape = x.shape
    orig_dtype = x.dtype
    n = 1
    for d in orig_shape:
        n *= int(d)
    if n == 0:
        return x

    # Widest lane-dense column count that divides n exactly -> the reshape is
    # a free metadata op (no pad / concat / slice HBM passes).
    cols = None
    for c in (4096, 2048, 1024, 512, 256, _LANES):
        if n % c == 0:
            cols = c
            break

    if cols is None:
        # Genuinely ragged: a single fused jnp multiply is exactly one read +
        # one write of x, strictly cheaper than any pad->kernel->slice combo.
        scale = jnp.minimum(jnp.exp(log_logit_scale[0]),
                            max_logit_scale).astype(orig_dtype)
        return scale * x

    rows = n // cols
    x2d = x.reshape(rows, cols)

    itemsize = jnp.dtype(orig_dtype).itemsize
    # Packed-sublane multiple: 8 for 4-byte, 16 for 2-byte, 32 for 1-byte.
    sublane = max(8, 32 // max(itemsize, 1))

    target_rows = max(_TILE_BYTES // (cols * itemsize), sublane)
    if target_rows >= rows:
        block_rows = rows                              # full dim == legal
    else:
        block_rows = max((target_rows // sublane) * sublane, sublane)

    num_blocks = pl.cdiv(rows, block_rows)             # last block may be ragged

    kernel = functools.partial(_scale_kernel,
                               max_logit_scale=float(max_logit_scale))
    aliases = {1: 0} if donate_input else {}

    def _call(dim_semantics):
        return pl.pallas_call(
            kernel,
            out_shape=jax.ShapeDtypeStruct((rows, cols), orig_dtype),
            grid_spec=pltpu.PrefetchScalarGridSpec(
                num_scalar_prefetch=0,
                grid=(num_blocks,),
                in_specs=[
                    # Scalar parameter in SMEM; same value every grid step.
                    pl.BlockSpec(memory_space=pltpu.SMEM),
                    pl.BlockSpec((block_rows, cols), lambda i: (i, 0)),
                ],
                out_specs=pl.BlockSpec((block_rows, cols), lambda i: (i, 0)),
            ),
            input_output_aliases=aliases,
            compiler_params=pltpu.CompilerParams(
                dimension_semantics=dim_semantics,
                vmem_limit_bytes=_VMEM_LIMIT_BYTES,
            ),
        )(log_logit_scale, x2d)

    if _IS_V7 and num_blocks >= 2:
        # Split the row grid across both TensorCores' DMA engines on v7x; fall
        # back cleanly if this jax/libtpu combo rejects CORE_PARALLEL here.
        try:
            out2d = _call((pltpu.CORE_PARALLEL,))
        except Exception:
            out2d = _call(("parallel",))
    else:
        out2d = _call(("parallel",))

    return out2d.reshape(orig_shape)


class LearnableLogitScalingPallas:
    """Mirror of the PyTorch module; parameter initialized deterministically."""

    def __init__(self, logit_scale_init=1 / 0.07, learnable=True,
                 max_logit_scale=100.0):
        self.max_logit_scale = max_logit_scale
        self.logit_scale_init = logit_scale_init
        self.learnable = learnable  # forward is identical either way
        # torch.ones([]) * np.log(logit_scale_init) -> scalar parameter
        self.log_logit_scale = jnp.array([np.log(logit_scale_init)],
                                         dtype=jnp.float32)

    def __call__(self, x, *, donate_input=False):
        return learnable_logit_scaling(
            x, self.log_logit_scale,
            max_logit_scale=self.max_logit_scale,
            donate_input=donate_input)


if __name__ == "__main__":
    module = LearnableLogitScalingPallas()
    scale_ref = float(jnp.minimum(jnp.exp(module.log_logit_scale[0]),
                                  module.max_logit_scale))

    # 1) Small NCHW-like f32 input: batch=2, channels=4, spatial=16x16.
    x = jax.random.normal(jax.random.PRNGKey(0), (2, 4, 16, 16),
                          dtype=jnp.float32)
    out = jax.block_until_ready(module(x))
    np.testing.assert_allclose(np.asarray(out), scale_ref * np.asarray(x),
                               rtol=1e-6, atol=1e-6)

    # 2) Multi-block f32 case (ragged last row-block on v5e/v6e tilings).
    x_big = jax.random.normal(jax.random.PRNGKey(2), (3, 384, 1024),
                              dtype=jnp.float32)
    out_big = jax.block_until_ready(module(x_big))
    np.testing.assert_allclose(np.asarray(out_big),
                               scale_ref * np.asarray(x_big),
                               rtol=1e-6, atol=1e-6)

    # 3) bf16 Pallas path (packed-sublane rounding; dtype-preserving output).
    x_bf = jax.random.normal(jax.random.PRNGKey(3), (4, 64, 256),
                             dtype=jnp.bfloat16)
    out_bf = jax.block_until_ready(module(x_bf))
    assert out_bf.dtype == jnp.bfloat16
    np.testing.assert_allclose(np.asarray(out_bf, dtype=np.float32),
                               np.asarray(
                                   (jnp.bfloat16(scale_ref) * x_bf)
                                   .astype(jnp.float32)),
                               rtol=2e-2, atol=2e-2)

    # 4) Genuinely ragged element count -> fused jnp fallback (no pad/slice).
    x_rag = jax.random.normal(jax.random.PRNGKey(1), (3, 5, 96),
                              dtype=jnp.bfloat16)
    out_rag = jax.block_until_ready(module(x_rag))
    assert out_rag.dtype == jnp.bfloat16
    np.testing.assert_allclose(np.asarray(out_rag, dtype=np.float32),
                               np.asarray(
                                   (jnp.bfloat16(scale_ref) * x_rag)
                                   .astype(jnp.float32)),
                               rtol=2e-2, atol=2e-2)

    print("KERNEL_OK")
</pallas_src>

<mosaic_0001>
module attributes {stable_mosaic.version = 11 : i64} {
  func.func @_scale_kernel(%arg0: i32, %arg1: memref<1xf32, #tpu.memory_space<smem>>, %arg2: memref<1x2048xf32, #tpu.memory_space<vmem>>, %arg3: memref<1x2048xf32, #tpu.memory_space<vmem>>) attributes {dimension_semantics = [#tpu.dimension_semantics<parallel>], iteration_bounds = array<i64: 1>, scalar_prefetch = 0 : i64, scratch_operands = 0 : i64, tpu.core_type = #tpu.core_type<tc>, window_params = [{transform_indices = @transform_0, window_bounds = array<i64: 1>}, {transform_indices = @transform_1, window_bounds = array<i64: 1, 2048>}, {transform_indices = @transform_2, window_bounds = array<i64: 1, 2048>}]} {
    %c0 = arith.constant 0 : index
    %0 = memref.load %arg1[%c0] : memref<1xf32, #tpu.memory_space<smem>>
    %1 = math.exp %0 : f32
    %cst = arith.constant 1.000000e+02 : f32
    %2 = arith.minimumf %1, %cst : f32
    %c0_0 = arith.constant 0 : index
    %c0_1 = arith.constant 0 : index
    %3 = vector.load %arg2[%c0_0, %c0_1] : memref<1x2048xf32, #tpu.memory_space<vmem>>, vector<1x2048xf32>
    %4 = vector.broadcast %2 : f32 to vector<1x2048xf32>
    %5 = arith.mulf %3, %4 : vector<1x2048xf32>
    %c0_2 = arith.constant 0 : index
    %c0_3 = arith.constant 0 : index
    %6 = vector.load %arg3[%c0_2, %c0_3] : memref<1x2048xf32, #tpu.memory_space<vmem>>, vector<1x2048xf32>
    tpu.vector_store %arg3[%c0_2, %c0_3], %5 {strides = array<i32>} : memref<1x2048xf32, #tpu.memory_space<vmem>>, vector<1x2048xf32>,
    return
  }
  func.func @transform_0(%arg0: i32) -> i32 {
    %c0_i32 = arith.constant 0 : i32
    %c0_i32_0 = arith.constant 0 : i32
    return %c0_i32 : i32
  }
  func.func @transform_1(%arg0: i32) -> (i32, i32) {
    %c0_i32 = arith.constant 0 : i32
    %c0_i32_0 = arith.constant 0 : i32
    return %arg0, %c0_i32 : i32, i32
  }
  func.func @transform_2(%arg0: i32) -> (i32, i32) {
    %c0_i32 = arith.constant 0 : i32
    %c0_i32_0 = arith.constant 0 : i32
    return %arg0, %c0_i32 : i32, i32
  }
}

</mosaic_0001>

<bundles_post_ra>
// kernel: tpu_custom_call.1
= control target key start
LH: loop header
LB: loop body
LE: loop exit
PB: predicated region body
PF: predicated region fallthrough
CT: control target
= control target key end

     0   :  { %8 = vsyncpa [#allocation4], 0  ;;  %s143_s0 = inlined_call_operand.<no memory space> [shape: f32[1], index: 0, kind: input, shape index: {}]   ;;  %s144_s1 = inlined_call_operand.hbm [shape: f32[1,2048], index: 1, kind: input, shape index: {}]   ;;  %s145_s2 = inlined_call_operand.hbm [shape: f32[1,2048], index: 2, kind: output, shape index: {}]  }
   0x1   :  { %9 = vsyncpa [#allocation5], 0  ;;  %s17_s11 = sshll.u32 %s144_s1, 4  ;;  %s116_s12 = smov [#allocation3]   ;;  %v28_v0 = vstv %s143_s0  ;;  %s18_s11 = int_to_ptr.hbm [resolvable:$true] %s17_s11 }
   0x2   :  { %s19_s13 = sshll.u32 %s116_s12, 4  ;;  %s20_s13 = int_to_ptr.vmem [resolvable:$true] %s19_s13 }
   0x3   :  { %22 = dma.hbm_to_vmem [thread:$0]  %s18_s11, 256, %s20_s13, [#allocation4]  }
   0x4   :  { %112 = dma.done.wait [#allocation4], 256  }
   0x5   :  { %113 = vsyncadd [#allocation4], 4294967040  ;;  %v29_v1 = vmul.f32 1.442695, %v28_v0  ;;  %v33_v3 = vld [vmem:[#allocation3] sm:$0xff]  ;;  %v34_v4 = vld [vmem:[#allocation3 + $0x8] sm:$0xff] }
   0x6   :  { %s117_s17 = smov [#allocation6]   ;;  %s118_s18 = smov 100.0  }
   0x7   :  { %62 = vpow2.f32 %v29_v1  ;;  %s45_s1 = sshll.u32 %s117_s17, 4  ;;  %s47_s22 = sshll.u32 %s145_s2, 4  ;;  %s46_s1 = int_to_ptr.vmem [resolvable:$true] %s45_s1  ;;  %s48_s22 = int_to_ptr.hbm [resolvable:$true] %s47_s22 }
   0xd   :  { %v63_v2 = vpop.eup %62 }
   0xe   :  { %57 = vpush %v63_v2 }
  0x3f   :  { %s58_s16 = spop %57 }
  0x40   :  { %s32_s19 = smin.f32 %s118_s18, %s58_s16 }
  0x41   :  { %v35_v5 = vstv %s32_s19 }
  0x42   :  { %v36_v6 = vmul.f32 %v35_v5, %v33_v3  ;;  %v37_v7 = vmul.f32 %v35_v5, %v34_v4 }
  0x44   :  { %38 = vst [vmem:[#allocation6] sm:$0xff] %v36_v6 }
  0x45   :  { %39 = vst [vmem:[#allocation6 + $0x8] sm:$0xff] %v37_v7 }
  0x46   :  { %50 = dma.vmem_to_hbm [thread:$0]  %s46_s1, 256, %s48_s22, [#allocation5]  }
  0x47   :  { %114 = dma.done.wait [#allocation5], 256  }
  0x48   :  { %115 = vsyncadd [#allocation5], 4294967040 }
  0x49   :  { %55 = vsyncpa [#allocation4], 1 }
  0x4a   :  { %56 = vsyncpa [#allocation5], 1 }

</bundles_post_ra>
